<compile_context>
chip_gen: v7x
topology: tpu7x:2x2x1
jax: 0.10.0
libtpu: 0.0.40
codegen_flags: <defaults>
</compile_context>

<pallas_src>
import math
import functools

import jax
import jax.numpy as jnp
from jax.experimental import pallas as pl
from jax.experimental.pallas import tpu as pltpu


def _round_up(a, b):
    return (a + b - 1) // b * b


def _multi_margin_kernel(xn_ref, wn_ref, lab_ref, o_ref,
                         *, s, cos_m1, sin_m1, th, mm, m2, easy_margin, tn):
    # Grid: axis 0 = class tiles (outer), axis 1 = batch tiles (inner).
    j = pl.program_id(0)

    xn = xn_ref[...]                                              # (TB, K) bf16, pre-normalized
    wn = wn_ref[...]                                              # (TN, K) bf16, pre-normalized

    # cosine = xn @ wn.T -> (TB, TN) on the MXU with f32 accumulation.
    cosine = jax.lax.dot_general(
        xn, wn,
        dimension_numbers=(((1,), (1,)), ((), ())),
        preferred_element_type=jnp.float32,
    )

    tb = cosine.shape[0]
    # Fold the class-tile offset into the label so the iota stays a constant.
    col = jax.lax.broadcasted_iota(jnp.int32, (tb, tn), 1)        # loop-invariant
    lab_local = lab_ref[...] - j * tn                             # (TB, 1) int32
    mask = col == lab_local                                       # (TB, TN)

    # Per-row label cosine (0.0 when the label is not in this class tile; the
    # resulting phi is then unused by the select below, so it is harmless).
    c_lab = jnp.sum(jnp.where(mask, cosine, 0.0), axis=1, keepdims=True)  # (TB, 1)

    # Angular margin on the (TB, 1) label cosine only. Clamp the sqrt argument:
    # |cosine| can exceed 1 by rounding (torch has the same hazard).
    sine = jnp.sqrt(jnp.maximum(1.0 - c_lab * c_lab, 0.0))
    phi = c_lab * cos_m1 - sine * sin_m1
    if easy_margin:
        phi = jnp.where(c_lab > 0, phi, c_lab)
    else:
        phi = jnp.where(c_lab - th > 0, phi, c_lab - mm)

    # one_hot blend + m2 shift + s scale fused into one select (phi broadcasts).
    out = jnp.where(mask, phi - m2, cosine) * s
    o_ref[...] = out.astype(o_ref.dtype)


def multi_margin_product(x, weight, label, *, s=32.0, m1=0.2, m2=0.35,
                         easy_margin=False, tb=128, tn=512,
                         mxu_dtype=jnp.bfloat16, out_dtype=jnp.float32):
    """Forward pass of MultiMarginProduct.

    x:      (B, K) float32
    weight: (N, K) float32
    label:  (B,)   int32
    returns (B, N) out_dtype (default float32)
    """
    B, K = x.shape
    N, K2 = weight.shape
    assert K == K2

    cos_m1 = math.cos(m1)
    sin_m1 = math.sin(m1)
    th = math.cos(math.pi - m1)
    mm = math.sin(math.pi - m1) * m1

    # Tile sizes: respect the (8, 128) layout constraint, never exceed (padded) extents.
    tb = min(tb, _round_up(B, 8))
    tn = min(tn, _round_up(N, 128))

    out_isz = jnp.dtype(out_dtype).itemsize
    in_isz = jnp.dtype(mxu_dtype).itemsize

    def vmem_est(tb_, tn_):
        return (2 * tb_ * K * in_isz        # x double buffer
                + 2 * tn_ * K * in_isz      # weight double buffer
                + 2 * tb_ * tn_ * out_isz   # output double buffer
                + 2 * tb_ * 4)              # labels

    # Conservative cross-generation budget (v7x: 64 MiB VMEM per TensorCore).
    budget = 44 * 1024 * 1024
    while tn > 128 and vmem_est(tb, tn) > budget:
        tn = max(128, (tn // 2 // 128) * 128)
    # TODO(synk): for very large K (>= ~8k at tn=512), add an innermost "arbitrary"
    # K grid axis with a (tb, tn) f32 VMEM accumulator instead of shrinking tn, so
    # output stores stay lane-dense and the weight still streams exactly once.

    Bp = _round_up(B, tb)
    Np = _round_up(N, tn)

    # Pre-normalize both operands once in the wrapper (f32 math, then bf16 cast):
    # halves the weight HBM stream vs f32 and removes all in-kernel normalization.
    xsq = jnp.sum(x.astype(jnp.float32) ** 2, axis=1, keepdims=True)
    xn = (x.astype(jnp.float32) * jax.lax.rsqrt(jnp.maximum(xsq, 1e-24))).astype(mxu_dtype)
    wsq = jnp.sum(weight.astype(jnp.float32) ** 2, axis=1, keepdims=True)
    wn = (weight.astype(jnp.float32) * jax.lax.rsqrt(jnp.maximum(wsq, 1e-24))).astype(mxu_dtype)

    label2d = label.reshape(B, 1).astype(jnp.int32)

    if Bp != B:
        xn = jnp.pad(xn, ((0, Bp - B), (0, 0)))
        # Padded rows get label 0; harmless because those rows are sliced off below.
        label2d = jnp.pad(label2d, ((0, Bp - B), (0, 0)))
    if Np != N:
        wn = jnp.pad(wn, ((0, Np - N), (0, 0)))

    kernel = functools.partial(
        _multi_margin_kernel,
        s=s, cos_m1=cos_m1, sin_m1=sin_m1, th=th, mm=mm, m2=m2,
        easy_margin=easy_margin, tn=tn,
    )

    grid = (Np // tn, Bp // tb)   # class tiles OUTER, batch tiles INNER

    vmem_limit = min(max(vmem_est(tb, tn) + 2 * 1024 * 1024, 32 * 1024 * 1024),
                     48 * 1024 * 1024)

    # TODO(synk): optionally pipeline_mode=pl.Buffered(3) on the weight BlockSpec for
    # small-B / large-K cases where the next weight DMA is not hidden by compute.
    out = pl.pallas_call(
        kernel,
        out_shape=jax.ShapeDtypeStruct((Bp, Np), out_dtype),
        grid_spec=pltpu.PrefetchScalarGridSpec(
            num_scalar_prefetch=0,
            grid=grid,
            in_specs=[
                pl.BlockSpec((tb, K), lambda j, i: (i, 0)),   # normalized x tile (full K)
                pl.BlockSpec((tn, K), lambda j, i: (j, 0)),   # normalized weight tile (const over i)
                pl.BlockSpec((tb, 1), lambda j, i: (i, 0)),   # label tile
            ],
            out_specs=pl.BlockSpec((tb, tn), lambda j, i: (i, j)),
        ),
        compiler_params=pltpu.CompilerParams(
            # Both axes are fully independent now (no scratch carry), so both can
            # be megacore-sharded; within a core batch stays inner, so the weight
            # matrix is still streamed from HBM exactly once.
            dimension_semantics=("parallel", "parallel"),
            vmem_limit_bytes=vmem_limit,
        ),
    )(xn, wn, label2d)

    if Bp != B or Np != N:
        out = out[:B, :N]
    return out


def _xavier_uniform(key, shape, dtype=jnp.float32):
    # nn.init.xavier_uniform_ for a (out_feature, in_feature) matrix
    fan_out, fan_in = shape
    limit = math.sqrt(6.0 / (fan_in + fan_out))
    return jax.random.uniform(key, shape, dtype=dtype, minval=-limit, maxval=limit)


def _reference(x, weight, label, *, s=32.0, m1=0.2, m2=0.35, easy_margin=False):
    xn = x / jnp.maximum(jnp.linalg.norm(x, axis=1, keepdims=True), 1e-12)
    wn = weight / jnp.maximum(jnp.linalg.norm(weight, axis=1, keepdims=True), 1e-12)
    cosine = xn @ wn.T
    sine = jnp.sqrt(jnp.maximum(1.0 - cosine ** 2, 0.0))
    cos_m1, sin_m1 = math.cos(m1), math.sin(m1)
    th = math.cos(math.pi - m1)
    mm = math.sin(math.pi - m1) * m1
    phi = cosine * cos_m1 - sine * sin_m1
    if easy_margin:
        phi = jnp.where(cosine > 0, phi, cosine)
    else:
        phi = jnp.where(cosine - th > 0, phi, cosine - mm)
    one_hot = jax.nn.one_hot(label, cosine.shape[1], dtype=cosine.dtype)
    out = one_hot * phi + (1.0 - one_hot) * cosine
    out = out - one_hot * m2
    return out * s


if __name__ == "__main__":
    # Small, module-consistent shapes: batch=64, in_feature=128, out_feature=512
    B, K, N = 64, 128, 512
    key = jax.random.PRNGKey(0)
    kx, kw, kl = jax.random.split(key, 3)

    x = jax.random.normal(kx, (B, K), dtype=jnp.float32)
    weight = _xavier_uniform(kw, (N, K))
    label = jax.random.randint(kl, (B,), 0, N, dtype=jnp.int32)

    out = multi_margin_product(x, weight, label, s=32.0, m1=0.2, m2=0.35,
                               easy_margin=False)
    out = jax.block_until_ready(out)

    ref = _reference(x, weight, label, s=32.0, m1=0.2, m2=0.35, easy_margin=False)
    assert out.shape == (B, N)
    # bf16 MXU inputs (f32 accumulation): ~1e-2 cosine-level agreement, i.e. ~0.3
    # absolute after the s=32 scale. Deliberate precision/bandwidth tradeoff.
    err = float(jnp.max(jnp.abs(out - ref)))
    assert err < 0.5, err

    print("KERNEL_OK")
</pallas_src>

<mosaic_0001>
module attributes {stable_mosaic.version = 11 : i64} {
  func.func @_multi_margin_kernel(%arg0: i32, %arg1: i32, %arg2: memref<64x128xbf16, #tpu.memory_space<vmem>>, %arg3: memref<512x128xbf16, #tpu.memory_space<vmem>>, %arg4: memref<64x1xi32, #tpu.memory_space<vmem>>, %arg5: memref<64x512xf32, #tpu.memory_space<vmem>>) attributes {dimension_semantics = [#tpu.dimension_semantics<parallel>, #tpu.dimension_semantics<parallel>], iteration_bounds = array<i64: 1, 1>, scalar_prefetch = 0 : i64, scratch_operands = 0 : i64, tpu.core_type = #tpu.core_type<tc>, window_params = [{transform_indices = @transform_0, window_bounds = array<i64: 64, 128>}, {transform_indices = @transform_1, window_bounds = array<i64: 512, 128>}, {transform_indices = @transform_2, window_bounds = array<i64: 64, 1>}, {transform_indices = @transform_3, window_bounds = array<i64: 64, 512>}]} {
    %c0 = arith.constant 0 : index
    %c0_0 = arith.constant 0 : index
    %0 = vector.load %arg2[%c0, %c0_0] : memref<64x128xbf16, #tpu.memory_space<vmem>>, vector<64x128xbf16>
    %c0_1 = arith.constant 0 : index
    %c0_2 = arith.constant 0 : index
    %1 = vector.load %arg3[%c0_1, %c0_2] : memref<512x128xbf16, #tpu.memory_space<vmem>>, vector<512x128xbf16>
    %cst = arith.constant dense<0.000000e+00> : vector<64x512xf32>
    %2 = tpu.matmul %0, %1, %cst {dimension_numbers = #tpu.dot_dimension_numbers<[1], [1], [0], [0], [0, 0, 1, 0], [], []>} : vector<64x128xbf16>, vector<512x128xbf16>, vector<64x512xf32> -> vector<64x512xf32>
    %3 = tpu.iota {dimensions = array<i32: 1>} : vector<64x512xi32>
    %c0_3 = arith.constant 0 : index
    %c0_4 = arith.constant 0 : index
    %4 = vector.load %arg4[%c0_3, %c0_4] : memref<64x1xi32, #tpu.memory_space<vmem>>, vector<64x1xi32>
    %c512_i32 = arith.constant 512 : i32
    %5 = arith.muli %arg0, %c512_i32 : i32
    %6 = vector.broadcast %5 : i32 to vector<64x1xi32>
    %7 = arith.subi %4, %6 : vector<64x1xi32>
    %8 = vector.broadcast %7 : vector<64x1xi32> to vector<64x512xi32>
    %9 = arith.cmpi eq, %3, %8 : vector<64x512xi32>
    %cst_5 = arith.constant 0.000000e+00 : f32
    %10 = vector.broadcast %cst_5 : f32 to vector<64x512xf32>
    %11 = arith.select %9, %2, %10 : vector<64x512xi1>, vector<64x512xf32>
    %cst_6 = arith.constant dense<0.000000e+00> : vector<64xf32>
    %12 = vector.multi_reduction <add>, %11, %cst_6 [1] : vector<64x512xf32> to vector<64xf32>
    %13 = vector.shape_cast %12 : vector<64xf32> to vector<64x1xf32>
    %14 = arith.mulf %13, %13 : vector<64x1xf32>
    %cst_7 = arith.constant 1.000000e+00 : f32
    %15 = vector.broadcast %cst_7 : f32 to vector<64x1xf32>
    %16 = arith.subf %15, %14 : vector<64x1xf32>
    %cst_8 = arith.constant 0.000000e+00 : f32
    %17 = vector.broadcast %cst_8 : f32 to vector<64x1xf32>
    %18 = arith.maximumf %16, %17 : vector<64x1xf32>
    %19 = math.sqrt %18 : vector<64x1xf32>
    %cst_9 = arith.constant 0.980066597 : f32
    %20 = vector.broadcast %cst_9 : f32 to vector<64x1xf32>
    %21 = arith.mulf %13, %20 : vector<64x1xf32>
    %cst_10 = arith.constant 0.198669329 : f32
    %22 = vector.broadcast %cst_10 : f32 to vector<64x1xf32>
    %23 = arith.mulf %19, %22 : vector<64x1xf32>
    %24 = arith.subf %21, %23 : vector<64x1xf32>
    %cst_11 = arith.constant -0.980066597 : f32
    %25 = vector.broadcast %cst_11 : f32 to vector<64x1xf32>
    %26 = arith.subf %13, %25 : vector<64x1xf32>
    %cst_12 = arith.constant 0.000000e+00 : f32
    %27 = vector.broadcast %cst_12 : f32 to vector<64x1xf32>
    %28 = arith.cmpf ogt, %26, %27 : vector<64x1xf32>
    %cst_13 = arith.constant 0.0397338644 : f32
    %29 = vector.broadcast %cst_13 : f32 to vector<64x1xf32>
    %30 = arith.subf %13, %29 : vector<64x1xf32>
    %31 = arith.select %28, %24, %30 : vector<64x1xi1>, vector<64x1xf32>
    %cst_14 = arith.constant 3.500000e-01 : f32
    %32 = vector.broadcast %cst_14 : f32 to vector<64x1xf32>
    %33 = arith.subf %31, %32 : vector<64x1xf32>
    %34 = vector.shape_cast %33 : vector<64x1xf32> to vector<64x1xf32>
    %35 = vector.broadcast %34 : vector<64x1xf32> to vector<64x512xf32>
    %36 = arith.select %9, %35, %2 : vector<64x512xi1>, vector<64x512xf32>
    %cst_15 = arith.constant 3.200000e+01 : f32
    %37 = vector.broadcast %cst_15 : f32 to vector<64x512xf32>
    %38 = arith.mulf %36, %37 : vector<64x512xf32>
    %c0_16 = arith.constant 0 : index
    %c0_17 = arith.constant 0 : index
    %39 = vector.load %arg5[%c0_16, %c0_17] : memref<64x512xf32, #tpu.memory_space<vmem>>, vector<64x512xf32>
    tpu.vector_store %arg5[%c0_16, %c0_17], %38 {strides = array<i32>} : memref<64x512xf32, #tpu.memory_space<vmem>>, vector<64x512xf32>,
    return
  }
  func.func @transform_0(%arg0: i32, %arg1: i32) -> (i32, i32) {
    %c0_i32 = arith.constant 0 : i32
    %c0_i32_0 = arith.constant 0 : i32
    return %arg1, %c0_i32 : i32, i32
  }
  func.func @transform_1(%arg0: i32, %arg1: i32) -> (i32, i32) {
    %c0_i32 = arith.constant 0 : i32
    %c0_i32_0 = arith.constant 0 : i32
    return %arg0, %c0_i32 : i32, i32
  }
  func.func @transform_2(%arg0: i32, %arg1: i32) -> (i32, i32) {
    %c0_i32 = arith.constant 0 : i32
    %c0_i32_0 = arith.constant 0 : i32
    return %arg1, %c0_i32 : i32, i32
  }
  func.func @transform_3(%arg0: i32, %arg1: i32) -> (i32, i32) {
    %c0_i32 = arith.constant 0 : i32
    return %arg1, %arg0 : i32, i32
  }
}

</mosaic_0001>

<bundles_post_ra>
// kernel: tpu_custom_call.1
= control target key start
LH: loop header
LB: loop body
LE: loop exit
PB: predicated region body
PF: predicated region fallthrough
CT: control target
= control target key end

     0   :  { %8 = vsyncpa [#allocation3], 0  ;;  %s1719_s0 = inlined_call_operand.vmem [shape: bf16[64,128], index: 0, kind: input, shape index: {}]   ;;  %s1720_s1 = inlined_call_operand.hbm [shape: bf16[512,128], index: 1, kind: input, shape index: {}]   ;;  %s1721_s2 = inlined_call_operand.vmem [shape: s32[64,1], index: 2, kind: input, shape index: {}]   ;;  %s1722_s3 = inlined_call_operand.hbm [shape: f32[64,512], index: 3, kind: output, shape index: {}]  }
   0x1   :  { %9 = vsyncpa [#allocation4], 0  ;;  %s1089_s12 = smov [#allocation2]   ;;  %s1041_s16 = scalar_lea.hbm %s1720_s1, 4096 }
   0x2   :  { %s17_s13 = sshll.u32 %s1089_s12, 4  ;;  %p1042_p0 = scmp.ne.s32.totalorder %s1720_s1, %s1041_s16  ;;  %s18_s13 = int_to_ptr.vmem [resolvable:$true] %s17_s13 }
   0x3   :  { %p1045_p1 = scmp.lt.u32.totalorder %s1041_s16, %s1720_s1 }
   0x5   :  { %p1047_p2 = pnand %p1045_p1, %p1042_p0 }
   0x7   :  { %1050 = shalt.err (!%p1047_p2)
}
   0x8   :  { %s1051_s21 = scalar_lea.vmem %s18_s13, 4096  ;;  %p1056_p4 = scmp.lt.s32.totalorder %s18_s13, %s18_s13 }
   0x9   :  { %p1052_p3 = scmp.ne.s32.totalorder %s18_s13, %s1051_s21  ;;  %p1057_p5 = scmp.lt.s32.totalorder %s1051_s21, %s1051_s21 }
   0xb   :  { %p1058_p6 = por %p1057_p5, %p1056_p4 }
   0xd   :  { %p1059_p7 = pnand %p1058_p6, %p1052_p3 }
   0xf   :  { %1062 = shalt.err (!%p1059_p7)
}
  0x10   :  { %s1090_s22 = smov 64   ;;  %s1091_s23 = smov 4  }
  0x11   :  { %23 = dma.hbm_to_vmem [thread:$0]  %s1720_s1, 4096, %s18_s13, [#allocation3], %s1090_s22, %s1090_s22, %s1091_s23  }
  0x12   :  { %1085 = dma.done.wait [#allocation3], 4096  }
  0x13   :  { %1086 = vsyncadd [#allocation3], 4294963200  ;;  %v1092_v0 = vmov 0   ;;  %v989_v1 = vld [vmem:[#allocation2 + $0x40] sm:$0xff]   ;;  %v993_v5 = vld [vmem:[#allocation2 + $0x48] sm:$0xff]   ;;  %v464_v45 = vlaneseq }
  0x14   :  { %987 = vset.pattern.permute.xlu0 %v1092_v0  ;;  %988 = vset.pattern.permute.xlu1 %v1092_v0  ;;  %v990_v2 = vld [vmem:[#allocation2 + $0xc0] sm:$0xff]   ;;  %v994_v6 = vld [vmem:[#allocation2 + $0xc8] sm:$0xff]   ;;  %v997_v9 = vld [vmem:[#allocation2 + $0x50] sm:$0xff]  }
  0x15   :  { %932 = vmatprep.subr.bf16.mxu0 %v989_v1  ;;  %v991_v3 = vld [vmem:[#allocation2] sm:$0xff]   ;;  %956 = vmatprep.subr.bf16.mxu1 %v990_v2  ;;  %v995_v7 = vld [vmem:[#allocation2 + $0x8] sm:$0xff]   ;;  %v998_v10 = vld [vmem:[#allocation2 + $0xd0] sm:$0xff]   ;;  %v1166_v47 = vand.u32 127, %v464_v45 }
  0x16   :  { %v992_v4 = vld [vmem:[#allocation2 + $0x80] sm:$0xff]   ;;  %933 = vmatpush3.bf16.xpose.msra.mxu0 %v991_v3  ;;  %v996_v8 = vld [vmem:[#allocation2 + $0x88] sm:$0xff]   ;;  %v999_v11 = vld [vmem:[#allocation2 + $0x10] sm:$0xff]  }
  0x17   :  { %957 = vmatpush3.bf16.xpose.msra.mxu1 %v992_v4  ;;  %934 = vmatprep.subr.bf16.mxu0 %v993_v5  ;;  %v1000_v12 = vld [vmem:[#allocation2 + $0x90] sm:$0xff]   ;;  %v1001_v13 = vld [vmem:[#allocation2 + $0x58] sm:$0xff]   ;;  %v1005_v17 = vld [vmem:[#allocation2 + $0x60] sm:$0xff]   ;;  %v1169_v48 = vadd.s32 256, %v1166_v47  ;;  %v1172_v49 = vadd.s32 128, %v1166_v47  ;;  %v1183_v51 = vadd.s32 384, %v1166_v47 }
  0x18   :  { %958 = vmatprep.subr.bf16.mxu1 %v994_v6  ;;  %v1002_v14 = vld [vmem:[#allocation2 + $0xd8] sm:$0xff]   ;;  %v1006_v18 = vld [vmem:[#allocation2 + $0xe0] sm:$0xff]   ;;  %v1009_v22 = vld [vmem:[#allocation2 + $0x68] sm:$0xff]  }
  0x19   :  { %v1003_v15 = vld [vmem:[#allocation2 + $0x18] sm:$0xff]   ;;  %v1007_v19 = vld [vmem:[#allocation2 + $0x20] sm:$0xff]   ;;  %v1010_v23 = vld [vmem:[#allocation2 + $0xe8] sm:$0xff]  }
  0x1a   :  { %v1004_v16 = vld [vmem:[#allocation2 + $0x98] sm:$0xff]   ;;  %v1008_v20 = vld [vmem:[#allocation2 + $0xa0] sm:$0xff]   ;;  %v471_v25 = vld [vmem:[%s1721_s2 + $0x10] sm:$0xff] }
  0x1b   :  { %v1021_v21 = vld [vmem:[%s1719_s0] sm:$0xff]   ;;  %v470_v26 = vld [vmem:[%s1721_s2 + $0x8] sm:$0xff]  ;;  %494 = vperm.xlu1 %988, %v471_v25   ;;  %v472_v28 = vld [vmem:[%s1721_s2 + $0x18] sm:$0xff] }
  0x1c   :  { %948 = vmatprep.mubr.bf16.mxu0 %v1021_v21  ;;  %972 = vmatprep.mubr.bf16.mxu1 %v1021_v21  ;;  %v469_v24 = vld [vmem:[%s1721_s2] sm:$0xff]  ;;  %v1011_v27 = vld [vmem:[#allocation2 + $0x28] sm:$0xff]   ;;  %v1013_v30 = vld [vmem:[#allocation2 + $0x70] sm:$0xff]  }
  0x1d   :  { %488 = vperm.xlu0 %987, %v469_v24   ;;  %v1012_v29 = vld [vmem:[#allocation2 + $0xa8] sm:$0xff]   ;;  %v1014_v31 = vld [vmem:[#allocation2 + $0xf0] sm:$0xff]   ;;  %v473_v32 = vld [vmem:[%s1721_s2 + $0x20] sm:$0xff] }
  0x1e   :  { %935 = vmatpush3.bf16.xpose.msra.mxu0 %v995_v7  ;;  %v474_v33 = vld [vmem:[%s1721_s2 + $0x28] sm:$0xff]  ;;  %v475_v34 = vld [vmem:[%s1721_s2 + $0x30] sm:$0xff]  ;;  %v476_v36 = vld [vmem:[%s1721_s2 + $0x38] sm:$0xff] }
  0x1f   :  { %959 = vmatpush3.bf16.xpose.msra.mxu1 %v996_v8  ;;  %936 = vmatprep.subr.bf16.mxu0 %v997_v9  ;;  %v1015_v35 = vld [vmem:[#allocation2 + $0x30] sm:$0xff]   ;;  %v1017_v38 = vld [vmem:[#allocation2 + $0x78] sm:$0xff]   ;;  %v1022_v42 = vld [vmem:[%s1719_s0 + $0x8] sm:$0xff]  }
  0x20   :  { %960 = vmatprep.subr.bf16.mxu1 %v998_v10  ;;  %497 = vperm.xlu1 %988, %v472_v28   ;;  %v1016_v37 = vld [vmem:[#allocation2 + $0xb0] sm:$0xff]   ;;  %v1018_v39 = vld [vmem:[#allocation2 + $0xf8] sm:$0xff]  }
  0x21   :  { %491 = vperm.xlu0 %987, %v470_v26   ;;  %v1019_v40 = vld [vmem:[#allocation2 + $0x38] sm:$0xff]   ;;  %v1023_v43 = vld [vmem:[%s1719_s0 + $0x10] sm:$0xff]  }
  0x22   :  { %v1020_v41 = vld [vmem:[#allocation2 + $0xb8] sm:$0xff]  }
  0x23   :  { %v1024_v44 = vld [vmem:[%s1719_s0 + $0x18] sm:$0xff]   ;;  %s1093_s0 = smov [#allocation5]  }
  0x24   :  { %503 = vperm.xlu1 %988, %v474_v33   ;;  %s860_s21 = sshll.u32 %s1093_s0, 4  ;;  %s861_s21 = int_to_ptr.vmem [resolvable:$true] %s860_s21 }
  0x25   :  { %500 = vperm.xlu0 %987, %v473_v32   ;;  %s1063_s22 = scalar_lea.vmem %s861_s21, 4096  ;;  %p1068_p9 = scmp.lt.s32.totalorder %s861_s21, %s861_s21 }
  0x26   :  { %937 = vmatpush3.bf16.xpose.msra.mxu0 %v999_v11  ;;  %p1064_p8 = scmp.ne.s32.totalorder %s861_s21, %s1063_s22  ;;  %p1069_p10 = scmp.lt.s32.totalorder %s1063_s22, %s1063_s22 }
  0x27   :  { %961 = vmatpush3.bf16.xpose.msra.mxu1 %v1000_v12  ;;  %938 = vmatprep.subr.bf16.mxu0 %v1001_v13 }
  0x28   :  { %962 = vmatprep.subr.bf16.mxu1 %v1002_v14  ;;  %509 = vperm.xlu1 %988, %v476_v36   ;;  %p1070_p11 = por %p1069_p10, %p1068_p9 }
  0x29   :  { %506 = vperm.xlu0 %987, %v475_v34  }
  0x2a   :  { %p1071_p12 = pnand %p1070_p11, %p1064_p8 }
  0x2e   :  { %939 = vmatpush3.bf16.xpose.msra.mxu0 %v1003_v15 }
  0x2f   :  { %963 = vmatpush3.bf16.xpose.msra.mxu1 %v1004_v16  ;;  %940 = vmatprep.subr.bf16.mxu0 %v1005_v17 }
  0x30   :  { %964 = vmatprep.subr.bf16.mxu1 %v1006_v18 }
  0x36   :  { %941 = vmatpush3.bf16.xpose.msra.mxu0 %v1007_v19 }
  0x37   :  { %965 = vmatpush3.bf16.xpose.msra.mxu1 %v1008_v20  ;;  %942 = vmatprep.subr.bf16.mxu0 %v1009_v22 }
  0x38   :  { %966 = vmatprep.subr.bf16.mxu1 %v1010_v23 }
  0x3e   :  { %943 = vmatpush3.bf16.xpose.msra.mxu0 %v1011_v27 }
  0x3f   :  { %967 = vmatpush3.bf16.xpose.msra.mxu1 %v1012_v29  ;;  %944 = vmatprep.subr.bf16.mxu0 %v1013_v30 }
  0x40   :  { %968 = vmatprep.subr.bf16.mxu1 %v1014_v31 }
  0x46   :  { %945 = vmatpush3.bf16.xpose.msra.mxu0 %v1015_v35 }
  0x47   :  { %969 = vmatpush3.bf16.xpose.msra.mxu1 %v1016_v37  ;;  %946 = vmatprep.subr.bf16.mxu0 %v1017_v38 }
  0x48   :  { %970 = vmatprep.subr.bf16.mxu1 %v1018_v39 }
  0x4e   :  { %947 = vmatpush3.bf16.xpose.msra.mxu0 %v1019_v40 }
  0x4f   :  { %971 = vmatpush3.bf16.xpose.msra.mxu1 %v1020_v41 }
  0x55   :  { %949 = vmatmul.mubr.bf16.vlgmr.msra.gmra.mrb[0].mxu0 %v1021_v21 }
  0x56   :  { %973 = vmatmul.mubr.bf16.vlgmr.msra.gmra.mrb[0].mxu1 %v1021_v21  ;;  %950 = vmatprep.mubr.bf16.mxu0 %v1022_v42 }
  0x57   :  { %974 = vmatprep.mubr.bf16.mxu1 %v1022_v42 }
  0x5d   :  { %951 = vmatmul.mubr.bf16.gmra.mrb[4].mxu0 %v1022_v42 }
  0x5e   :  { %975 = vmatmul.mubr.bf16.gmra.mrb[4].mxu1 %v1022_v42  ;;  %952 = vmatprep.mubr.bf16.mxu0 %v1023_v43 }
  0x5f   :  { %976 = vmatprep.mubr.bf16.mxu1 %v1023_v43 }
  0x65   :  { %953 = vmatmul.mubr.bf16.gmra.mrb[8].mxu0 %v1023_v43 }
  0x66   :  { %977 = vmatmul.mubr.bf16.gmra.mrb[8].mxu1 %v1023_v43  ;;  %954 = vmatprep.mubr.bf16.mxu0 %v1024_v44 }
  0x67   :  { %978 = vmatprep.mubr.bf16.mxu1 %v1024_v44 }
  0x6d   :  { %955 = vmatmul.mubr.bf16.gmra.mrb[12].mxu0 %v1024_v44 }
  0x6e   :  { %979 = vmatmul.mubr.bf16.gmra.mrb[12].mxu1 %v1024_v44 }
  0x9a   :  { %v1187_v53 = vpop.permute.xlu1 %494 }
  0x9b   :  { %vm519_vm8 = vcmp.eq.s32.totalorder %v1166_v47, %v1187_v53  ;;  %vm1755_vm9 = vcmp.eq.s32.totalorder %v1169_v48, %v1187_v53  ;;  %vm520_vm10 = vcmp.eq.s32.totalorder %v1172_v49, %v1187_v53  ;;  %vm1750_vm13 = vcmp.eq.s32.totalorder %v1183_v51, %v1187_v53 }
  0x9c   :  { %v1164_v46 = vpop.permute.xlu0 %488 }
  0x9d   :  { %vm511_vm0 = vcmp.eq.s32.totalorder %v1166_v47, %v1164_v46  ;;  %vm513_vm1 = vcmp.eq.s32.totalorder %v1169_v48, %v1164_v46  ;;  %vm512_vm2 = vcmp.eq.s32.totalorder %v1172_v49, %v1164_v46  ;;  %vm514_vm5 = vcmp.eq.s32.totalorder %v1183_v51, %v1164_v46 }
  0x9f   :  { %v1243_v7 = vpop.permute.xlu1 %497 }
  0xa0   :  { %v1174_v50 = vpop.permute.xlu0 %491  ;;  %vm1729_vm11 = vcmp.eq.s32.totalorder %v1166_v47, %v1243_v7  ;;  %vm1723_vm12 = vcmp.eq.s32.totalorder %v1172_v49, %v1243_v7  ;;  %vm1724_vm14 = vcmp.eq.s32.totalorder %v1169_v48, %v1243_v7  ;;  %vm1726_vm15 = vcmp.eq.s32.totalorder %v1183_v51, %v1243_v7 }
  0xa1   :  { %vm515_vm3 = vcmp.eq.s32.totalorder %v1166_v47, %v1174_v50  ;;  %vm516_vm4 = vcmp.eq.s32.totalorder %v1172_v49, %v1174_v50  ;;  %vm517_vm6 = vcmp.eq.s32.totalorder %v1169_v48, %v1174_v50  ;;  %vm518_vm7 = vcmp.eq.s32.totalorder %v1183_v51, %v1174_v50 }
  0xa3   :  { %v1309_v33 = vpop.permute.xlu1 %503 }
  0xa4   :  { %v1307_v30 = vpop.permute.xlu0 %500 }
 0x128   :  { %v1185_v52 = vpop.f32.mrb[0].mxu0 }
 0x129   :  { %v543_v54 = vsel %vm511_vm0, %v1185_v52, 0.0  ;;  %v1195_v55 = vpop.f32.mrb[0].mxu1  ;;  %v1197_v56 = vpop.f32.mrb[1].mxu0 }
 0x12a   :  { %v545_v57 = vsel %vm513_vm1, %v1195_v55, 0.0  ;;  %v544_v58 = vsel %vm512_vm2, %v1197_v56, 0.0  ;;  %v1209_v59 = vpop.f32.mrb[1].mxu1  ;;  %v1211_v60 = vpop.f32.mrb[2].mxu0 }
 0x12b   :  { %v575_v61 = vadd.f32 %v544_v58, %v543_v54  ;;  %v547_v62 = vsel %vm515_vm3, %v1211_v60, 0.0  ;;  %v1219_v63 = vpop.f32.mrb[2].mxu1  ;;  %v1223_v0 = vpop.f32.mrb[3].mxu0  ;;  %v546_v5 = vsel %vm514_vm5, %v1209_v59, 0.0 }
 0x12c   :  { %v548_v1 = vsel %vm516_vm4, %v1223_v0, 0.0  ;;  %v1229_v2 = vpop.f32.mrb[3].mxu1  ;;  %v549_v6 = vsel %vm517_vm6, %v1219_v63, 0.0 }
 0x12d   :  { %v580_v3 = vadd.f32 %v548_v1, %v547_v62  ;;  %v576_v4 = vadd.f32 %v575_v61, %v545_v57  ;;  %v550_v10 = vsel %vm518_vm7, %v1229_v2, 0.0  ;;  %v1361_v62 = vpop.permute.xlu0 %506 }
 0x12e   :  { %1763 = vst [vmem:[#allocation11_spill] sm:$0xff] %v1361_v62 }
 0x12f   :  { %v577_v8 = vadd.f32 %v576_v4, %v546_v5  ;;  %v581_v9 = vadd.f32 %v580_v3, %v549_v6  ;;  %v1375_v6 = vpop.permute.xlu1 %509 }
 0x130   :  { %v1253_v11 = vpop.f32.mrb[4].mxu0  ;;  %1764 = vst [vmem:[#allocation12_spill] sm:$0xff] %v1375_v6 }
 0x131   :  { %v551_v12 = vsel %vm519_vm8, %v1253_v11, 0.0  ;;  %v1261_v13 = vpop.f32.mrb[4].mxu1  ;;  %578 = vadd.xlane.f32.xlu0 %v577_v8  ;;  %v1263_v14 = vpop.f32.mrb[5].mxu0  ;;  %v582_v15 = vadd.f32 %v581_v9, %v550_v10 }
 0x132   :  { %v553_v16 = vsel %vm1755_vm9, %v1261_v13, 0.0  ;;  %v1271_v17 = vpop.f32.mrb[5].mxu1  ;;  %v552_v18 = vsel %vm520_vm10, %v1263_v14, 0.0  ;;  %v1277_v19 = vpop.f32.mrb[6].mxu0 }
 0x133   :  { %v585_v20 = vadd.f32 %v552_v18, %v551_v12  ;;  %v555_v21 = vsel %vm1729_vm11, %v1277_v19, 0.0  ;;  %v1285_v22 = vpop.f32.mrb[6].mxu1  ;;  %583 = vadd.xlane.f32.xlu1 %v582_v15  ;;  %v1289_v23 = vpop.f32.mrb[7].mxu0  ;;  %v554_v28 = vsel %vm1750_vm13, %v1271_v17, 0.0  ;;  %vm1732_vm11 = vcmp.eq.s32.totalorder %v1169_v48, %v1309_v33 }
 0x134   :  { %v1291_v24 = vpop.f32.mrb[7].mxu1  ;;  %v556_v25 = vsel %vm1723_vm12, %v1289_v23, 0.0  ;;  %v557_v29 = vsel %vm1724_vm14, %v1285_v22, 0.0  ;;  %vm1725_vm12 = vcmp.eq.s32.totalorder %v1166_v47, %v1307_v30  ;;  %vm1727_vm14 = vcmp.eq.s32.totalorder %v1172_v49, %v1307_v30 }
 0x135   :  { %v590_v26 = vadd.f32 %v556_v25, %v555_v21  ;;  %v586_v27 = vadd.f32 %v585_v20, %v553_v16  ;;  %v558_v34 = vsel %vm1726_vm15, %v1291_v24, 0.0  ;;  %vm1737_vm15 = vcmp.eq.s32.totalorder %v1169_v48, %v1307_v30 }
 0x137   :  { %v587_v31 = vadd.f32 %v586_v27, %v554_v28  ;;  %v591_v32 = vadd.f32 %v590_v26, %v557_v29 }
 0x138   :  { %v1315_v35 = vpop.f32.mrb[8].mxu0 }
 0x139   :  { %v559_v36 = vsel %vm1725_vm12, %v1315_v35, 0.0  ;;  %v1323_v37 = vpop.f32.mrb[8].mxu1  ;;  %588 = vadd.xlane.f32.xlu0 %v587_v31  ;;  %v1325_v38 = vpop.f32.mrb[9].mxu0  ;;  %v592_v39 = vadd.f32 %v591_v32, %v558_v34  ;;  %vm1728_vm12 = vcmp.eq.s32.totalorder %v1166_v47, %v1309_v33 }
 0x13a   :  { %v1329_v40 = vpop.f32.mrb[9].mxu1  ;;  %v560_v41 = vsel %vm1727_vm14, %v1325_v38, 0.0  ;;  %v1335_v42 = vpop.f32.mrb[10].mxu0  ;;  %vm1730_vm14 = vcmp.eq.s32.totalorder %v1172_v49, %v1309_v33  ;;  %v561_v57 = vsel %vm1737_vm15, %v1323_v37, 0.0  ;;  %vm1740_vm15 = vcmp.eq.s32.totalorder %v1169_v48, %v1375_v6 }
 0x13b   :  { %v595_v43 = vadd.f32 %v560_v41, %v559_v36  ;;  %v563_v44 = vsel %vm1728_vm12, %v1335_v42, 0.0  ;;  %v1345_v45 = vpop.f32.mrb[10].mxu1  ;;  %v1347_v54 = vpop.f32.mrb[11].mxu0  ;;  %vm1731_vm12 = vcmp.eq.s32.totalorder %v1183_v51, %v1307_v30 }
 0x13c   :  { %1760 = vst [vmem:[#allocation8_spill] sm:$0xff] %v1345_v45  ;;  %1761 = vst [vmem:[#allocation9_spill] sm:$0xff] %v1347_v54  ;;  %v564_v58 = vsel %vm1730_vm14, %v1347_v54, 0.0  ;;  %v1359_v61 = vpop.f32.mrb[11].mxu1  ;;  %v562_v4 = vsel %vm1731_vm12, %v1329_v40, 0.0  ;;  %v565_v5 = vsel %vm1732_vm11, %v1345_v45, 0.0  ;;  %vm1734_vm14 = vcmp.eq.s32.totalorder %v1183_v51, %v1309_v33 }
 0x13d   :  { %1762 = vst [vmem:[#allocation10_spill] sm:$0xff] %v1359_v61  ;;  %v600_v1 = vadd.f32 %v564_v58, %v563_v44  ;;  %593 = vadd.xlane.f32.xlu0 %v592_v39  ;;  %v596_v3 = vadd.f32 %v595_v43, %v561_v57  ;;  %v566_v10 = vsel %vm1734_vm14, %v1359_v61, 0.0  ;;  %vm1733_vm12 = vcmp.eq.s32.totalorder %v1166_v47, %v1361_v62 }
 0x13e   :  { %vm1735_vm11 = vcmp.eq.s32.totalorder %v1172_v49, %v1361_v62  ;;  %vm1749_vm14 = vcmp.eq.s32.totalorder %v1169_v48, %v1361_v62 }
 0x13f   :  { %v597_v8 = vadd.f32 %v596_v3, %v562_v4  ;;  %v601_v9 = vadd.f32 %v600_v1, %v565_v5 }
 0x140   :  { %v1383_v12 = vpop.f32.mrb[12].mxu0 }
 0x141   :  { %1765 = vst [vmem:[#allocation13_spill] sm:$0xff] %v1383_v12  ;;  %v567_v15 = vsel %vm1733_vm12, %v1383_v12, 0.0  ;;  %v1391_v16 = vpop.f32.mrb[12].mxu1  ;;  %598 = vadd.xlane.f32.xlu1 %v597_v8  ;;  %v1393_v18 = vpop.f32.mrb[13].mxu0  ;;  %v602_v20 = vadd.f32 %v601_v9, %v566_v10  ;;  %vm1736_vm12 = vcmp.eq.s32.totalorder %v1166_v47, %v1375_v6 }
 0x142   :  { %1766 = vst [vmem:[#allocation14_spill] sm:$0xff] %v1391_v16  ;;  %1767 = vst [vmem:[#allocation15_spill] sm:$0xff] %v1393_v18  ;;  %v1397_v21 = vpop.f32.mrb[13].mxu1  ;;  %v568_v25 = vsel %vm1735_vm11, %v1393_v18, 0.0  ;;  %v1403_v26 = vpop.f32.mrb[14].mxu0  ;;  %vm1738_vm11 = vcmp.eq.s32.totalorder %v1172_v49, %v1375_v6  ;;  %v569_v32 = vsel %vm1749_vm14, %v1391_v16, 0.0 }
 0x143   :  { %1768 = vst [vmem:[#allocation16_spill] sm:$0xff] %v1397_v21  ;;  %1769 = vst [vmem:[#allocation17_spill] sm:$0xff] %v1403_v26  ;;  %v605_v27 = vadd.f32 %v568_v25, %v567_v15  ;;  %v571_v28 = vsel %vm1736_vm12, %v1403_v26, 0.0  ;;  %v1413_v29 = vpop.f32.mrb[14].mxu1  ;;  %603 = vadd.xlane.f32.xlu0 %v602_v20  ;;  %v1415_v31 = vpop.f32.mrb[15].mxu0  ;;  %vm1741_vm12 = vcmp.eq.s32.totalorder %v1183_v51, %v1361_v62 }
 0x144   :  { %1770 = vst [vmem:[#allocation18_spill] sm:$0xff] %v1413_v29  ;;  %1771 = vst [vmem:[#allocation19_spill] sm:$0xff] %v1415_v31  ;;  %v1423_v34 = vpop.f32.mrb[15].mxu1  ;;  %v572_v36 = vsel %vm1738_vm11, %v1415_v31, 0.0  ;;  %v570_v43 = vsel %vm1741_vm12, %v1397_v21, 0.0  ;;  %v573_v44 = vsel %vm1740_vm15, %v1413_v29, 0.0  ;;  %vm1739_vm11 = vcmp.eq.s32.totalorder %v1183_v51, %v1375_v6 }
 0x145   :  { %1772 = vst [vmem:[#allocation20_spill] sm:$0xff] %v1423_v34  ;;  %v610_v39 = vadd.f32 %v572_v36, %v571_v28  ;;  %v606_v41 = vadd.f32 %v605_v27, %v569_v32  ;;  %v574_v1 = vsel %vm1739_vm11, %v1423_v34, 0.0 }
 0x147   :  { %v607_v57 = vadd.f32 %v606_v41, %v570_v43  ;;  %v611_v58 = vadd.f32 %v610_v39, %v573_v44 }
 0x149   :  { %608 = vadd.xlane.f32.xlu1 %v607_v57  ;;  %v612_v3 = vadd.f32 %v611_v58, %v574_v1 }
 0x14b   :  { %613 = vadd.xlane.f32.xlu0 %v612_v3 }
 0x1be   :  { %v579_v4 = vpop.xlane.xlu0 %578 }
 0x1bf   :  { %v615_v5 = vmul.f32 %v579_v4, %v579_v4  ;;  %v908_v39 = vadd.f32 0.9800666, %v579_v4  ;;  %v695_v44 = vmul.f32 0.9800666, %v579_v4  ;;  %v916_v57 = vadd.f32 -0.039733864, %v579_v4 }
 0x1c0   :  { %v584_v8 = vpop.xlane.xlu1 %583 }
 0x1c1   :  { %v623_v9 = vsub.f32 1.0, %v615_v5  ;;  %v616_v10 = vmul.f32 %v584_v8, %v584_v8  ;;  %v1450_v58 = vmul.f32 0.9800666, %v584_v8  ;;  %v1452_v1 = vadd.f32 0.9800666, %v584_v8 }
 0x1c2   :  { %vm727_vm12 = vcmp.gt.f32.partialorder %v908_v39, 0.0 }
 0x1c3   :  { %v631_v15 = vmax.f32 %v623_v9, 0.0  ;;  %v624_v20 = vsub.f32 1.0, %v616_v10  ;;  %v1454_v10 = vadd.f32 -0.039733864, %v584_v8  ;;  %vm728_vm9 = vcmp.gt.f32.partialorder %v1452_v1, 0.0 }
 0x1c5   :  { %1025 = vrsqrt.f32 %v631_v15  ;;  %v632_v25 = vmax.f32 %v624_v20, 0.0  ;;  %vm641_vm11 = vcmp.eq.f32.partialorder %v631_v15, inf  ;;  %vm643_vm15 = vcmp.eq.f32.partialorder %v631_v15, 0.0 }
 0x1c6   :  { %v589_v27 = vpop.xlane.xlu0 %588 }
 0x1c7   :  { %v617_v28 = vmul.f32 %v589_v27, %v589_v27  ;;  %1027 = vrsqrt.f32 %v632_v25  ;;  %v1456_v34 = vmul.f32 0.9800666, %v589_v27  ;;  %v1462_v31 = vadd.f32 0.9800666, %v589_v27 }
 0x1c8   :  { %v1464_v6 = vadd.f32 -0.039733864, %v589_v27  ;;  %vm648_vm14 = vcmp.eq.f32.partialorder %v632_v25, inf  ;;  %vm650_vm13 = vcmp.eq.f32.partialorder %v632_v25, 0.0  ;;  %v651_v27 = vand.u32 2147483648, %v632_v25 }
 0x1c9   :  { %v625_v32 = vsub.f32 1.0, %v617_v28 }
 0x1ca   :  { %v594_v36 = vpop.xlane.xlu0 %593 }
 0x1cb   :  { %v1447_v41 = vmax.f32 %v625_v32, 0.0  ;;  %v618_v43 = vmul.f32 %v594_v36, %v594_v36  ;;  %v644_v32 = vand.u32 2147483648, %v631_v15  ;;  %v1470_v16 = vmul.f32 0.9800666, %v594_v36 }
 0x1cd   :  { %1029 = vrsqrt.f32 %v1447_v41  ;;  %v626_v3 = vsub.f32 1.0, %v618_v43 }
 0x1ce   :  { %v599_v5 = vpop.xlane.xlu1 %598 }
 0x1cf   :  { %v1026_v9 = vpop.eup %1025  ;;  %v619_v20 = vmul.f32 %v599_v5, %v599_v5  ;;  %v1458_v4 = vmax.f32 %v626_v3, 0.0 }
 0x1d0   :  { %v640_v28 = vmul.f32 %v1026_v9, %v631_v15  ;;  %v1460_v29 = vpop.xlane.xlu0 %603 }
 0x1d1   :  { %v627_v43 = vsub.f32 1.0, %v619_v20  ;;  %v620_v26 = vmul.f32 %v1460_v29, %v1460_v29  ;;  %v1028_v21 = vpop.eup %1027  ;;  %1031 = vrsqrt.f32 %v1458_v4  ;;  %v1475_v20 = vadd.f32 0.9800666, %v594_v36 }
 0x1d2   :  { %v642_v8 = vsel %vm641_vm11, %v631_v15, %v640_v28  ;;  %v647_v3 = vmul.f32 %v1028_v21, %v632_v25  ;;  %vm655_vm11 = vcmp.eq.f32.partialorder %v1447_v41, inf  ;;  %v1478_v28 = vadd.f32 -0.039733864, %v594_v36 }
 0x1d3   :  { %v645_v9 = vsel %vm643_vm15, %v644_v32, %v642_v8  ;;  %v1472_v18 = vmax.f32 %v627_v43, 0.0  ;;  %v628_v12 = vsub.f32 1.0, %v620_v26  ;;  %vm657_vm15 = vcmp.eq.f32.partialorder %v1447_v41, 0.0 }
 0x1d4   :  { %v703_v62 = vmul.f32 0.19866933, %v645_v9  ;;  %v649_v61 = vsel %vm648_vm14, %v632_v25, %v647_v3  ;;  %v658_v26 = vand.u32 2147483648, %v1447_v41  ;;  %v1488_v3 = vmul.f32 0.9800666, %v599_v5 }
 0x1d5   :  { %1033 = vrsqrt.f32 %v1472_v18  ;;  %v652_v21 = vsel %vm650_vm13, %v651_v27, %v649_v61  ;;  %v1483_v32 = vmax.f32 %v628_v12, 0.0  ;;  %v1494_v61 = vadd.f32 0.9800666, %v599_v5 }
 0x1d6   :  { %v711_v15 = vsub.f32 %v695_v44, %v703_v62  ;;  %v1485_v43 = vpop.xlane.xlu1 %608  ;;  %v704_v9 = vmul.f32 0.19866933, %v652_v21  ;;  %v1498_v44 = vadd.f32 -0.039733864, %v599_v5  ;;  %v1501_v27 = vmul.f32 0.9800666, %v1460_v29 }
 0x1d7   :  { %v1030_v8 = vpop.eup %1029  ;;  %v621_v36 = vmul.f32 %v1485_v43, %v1485_v43  ;;  %1035 = vrsqrt.f32 %v1483_v32  ;;  %vm664_vm13 = vcmp.eq.f32.partialorder %v1458_v4, 0.0  ;;  %vm729_vm14 = vcmp.gt.f32.partialorder %v1462_v31, 0.0 }
 0x1d8   :  { %v743_v45 = vsel %vm727_vm12, %v711_v15, %v916_v57  ;;  %v654_v62 = vmul.f32 %v1030_v8, %v1447_v41  ;;  %v712_v25 = vsub.f32 %v1450_v58, %v704_v9  ;;  %vm662_vm12 = vcmp.eq.f32.partialorder %v1458_v4, inf }
 0x1d9   :  { %v924_v12 = vadd.f32 -0.35, %v743_v45  ;;  %v629_v39 = vsub.f32 1.0, %v621_v36 }
 0x1da   :  { %v656_v21 = vsel %vm655_vm11, %v1447_v41, %v654_v62  ;;  %v1525_v62 = vpop.xlane.xlu0 %613  ;;  %vm1776_vm11 = vcmp.eq.s32.totalorder %v1172_v49, %v1243_v7 }
 0x1db   :  { %v759_v45 = vsel %vm511_vm0, %v924_v12, %v1185_v52  ;;  %v760_v57 = vsel %vm512_vm2, %v924_v12, %v1197_v56  ;;  %v761_v58 = vsel %vm513_vm1, %v924_v12, %v1195_v55  ;;  %v762_v5 = vsel %vm514_vm5, %v924_v12, %v1209_v59  ;;  %v1032_v15 = vpop.eup %1031 }
 0x1dc   :  { %v791_v8 = vmul.f32 32.0, %v759_v45  ;;  %v792_v52 = vmul.f32 32.0, %v760_v57  ;;  %v793_v9 = vmul.f32 32.0, %v761_v58  ;;  %v794_v36 = vmul.f32 32.0, %v762_v5 }
 0x1dd   :  { %v744_v56 = vsel %vm728_vm9, %v712_v25, %v1454_v10  ;;  %v659_v55 = vsel %vm657_vm15, %v658_v26, %v656_v21  ;;  %v661_v54 = vmul.f32 %v1032_v15, %v1458_v4  ;;  %v1533_v46 = vmax.f32 %v629_v39, 0.0 }
 0x1de   :  { %823 = vst [vmem:[#allocation5] sm:$0xff] %v791_v8  ;;  %824 = vst [vmem:[#allocation5 + $0x8] sm:$0xff] %v792_v52  ;;  %v925_v59 = vadd.f32 -0.35, %v744_v56  ;;  %v705_v12 = vmul.f32 0.19866933, %v659_v55  ;;  %v622_v1 = vmul.f32 %v1525_v62, %v1525_v62  ;;  %vm1777_vm15 = vcmp.eq.s32.totalorder %v1169_v48, %v1243_v7 }
 0x1df   :  { %825 = vst [vmem:[#allocation5 + $0x10] sm:$0xff] %v793_v9  ;;  %826 = vst [vmem:[#allocation5 + $0x18] sm:$0xff] %v794_v36  ;;  %v665_v45 = vand.u32 2147483648, %v1458_v4  ;;  %vm669_vm0 = vcmp.eq.f32.partialorder %v1472_v18, inf  ;;  %v1034_v57 = vpop.eup %1033  ;;  %v663_v41 = vsel %vm662_vm12, %v1458_v4, %v661_v54  ;;  %vm671_vm1 = vcmp.eq.f32.partialorder %v1472_v18, 0.0 }
 0x1e0   :  { %1037 = vrsqrt.f32 %v1533_v46  ;;  %v763_v10 = vsel %vm515_vm3, %v925_v59, %v1211_v60  ;;  %v764_v26 = vsel %vm516_vm4, %v925_v59, %v1223_v0  ;;  %v765_v54 = vsel %vm517_vm6, %v925_v59, %v1219_v63 }
 0x1e1   :  { %v766_v25 = vsel %vm518_vm7, %v925_v59, %v1229_v2  ;;  %vm730_vm2 = vcmp.gt.f32.partialorder %v1475_v20, 0.0  ;;  %v795_v21 = vmul.f32 32.0, %v763_v10  ;;  %v796_v39 = vmul.f32 32.0, %v764_v26  ;;  %v1036_v5 = vpop.eup %1035 }
 0x1e2   :  { %v797_v60 = vmul.f32 32.0, %v765_v54  ;;  %v798_v58 = vmul.f32 32.0, %v766_v25  ;;  %v713_v15 = vsub.f32 %v1456_v34, %v705_v12  ;;  %v666_v0 = vsel %vm664_vm13, %v665_v45, %v663_v41 }
 0x1e3   :  { %v668_v8 = vmul.f32 %v1034_v57, %v1472_v18  ;;  %v672_v63 = vand.u32 2147483648, %v1472_v18  ;;  %vm731_vm3 = vcmp.gt.f32.partialorder %v1494_v61, 0.0  ;;  %827 = vst [vmem:[#allocation5 + $0x20] sm:$0xff] %v795_v21  ;;  %828 = vst [vmem:[#allocation5 + $0x28] sm:$0xff] %v796_v39  ;;  %v706_v50 = vmul.f32 0.19866933, %v666_v0 }
 0x1e4   :  { %829 = vst [vmem:[#allocation5 + $0x30] sm:$0xff] %v797_v60  ;;  %830 = vst [vmem:[#allocation5 + $0x38] sm:$0xff] %v798_v58  ;;  %v675_v2 = vmul.f32 %v1036_v5, %v1483_v32  ;;  %vm676_vm4 = vcmp.eq.f32.partialorder %v1483_v32, inf  ;;  %v630_v52 = vsub.f32 1.0, %v622_v1  ;;  %v745_v34 = vsel %vm729_vm14, %v713_v15, %v1464_v6 }
 0x1e5   :  { %v670_v4 = vsel %vm669_vm0, %v1472_v18, %v668_v8  ;;  %vm678_vm5 = vcmp.eq.f32.partialorder %v1483_v32, 0.0  ;;  %v679_v9 = vand.u32 2147483648, %v1483_v32  ;;  %v926_v36 = vadd.f32 -0.35, %v745_v34 }
 0x1e6   :  { %v714_v56 = vsub.f32 %v1470_v16, %v706_v50  ;;  %v673_v55 = vsel %vm671_vm1, %v672_v63, %v670_v4  ;;  %v677_v59 = vsel %vm676_vm4, %v1483_v32, %v675_v2  ;;  %v913_v6 = vadd.f32 0.9800666, %v1460_v29 }
 0x1e7   :  { %v707_v12 = vmul.f32 0.19866933, %v673_v55  ;;  %v680_v45 = vsel %vm678_vm5, %v679_v9, %v677_v59  ;;  %v1582_v31 = vmax.f32 %v630_v52, 0.0  ;;  %v767_v57 = vsel %vm519_vm8, %v926_v36, %v1253_v11 }
 0x1e8   :  { %v768_v16 = vsel %vm520_vm10, %v926_v36, %v1263_v14  ;;  %vm1773_vm6 = vcmp.eq.s32.totalorder %v1169_v48, %v1187_v53  ;;  %vm1774_vm7 = vcmp.eq.s32.totalorder %v1183_v51, %v1187_v53  ;;  %v799_v41 = vmul.f32 32.0, %v767_v57 }
 0x1e9   :  { %v769_v18 = vsel %vm1773_vm6, %v926_v36, %v1261_v13  ;;  %v770_v32 = vsel %vm1774_vm7, %v926_v36, %v1271_v17  ;;  %v800_v1 = vmul.f32 32.0, %v768_v16  ;;  %v746_v54 = vsel %vm730_vm2, %v714_v56, %v1478_v28 }
 0x1ea   :  { %v801_v10 = vmul.f32 32.0, %v769_v18  ;;  %v802_v26 = vmul.f32 32.0, %v770_v32  ;;  %v1038_v11 = vpop.eup %1037  ;;  %v715_v14 = vsub.f32 %v1488_v3, %v707_v12  ;;  %v708_v25 = vmul.f32 0.19866933, %v680_v45  ;;  %831 = vst [vmem:[#allocation5 + $0x40] sm:$0xff] %v799_v41 }
 0x1eb   :  { %1039 = vrsqrt.f32 %v1582_v31  ;;  %832 = vst [vmem:[#allocation5 + $0x48] sm:$0xff] %v800_v1  ;;  %v927_v53 = vadd.f32 -0.35, %v746_v54  ;;  %vm732_vm8 = vcmp.gt.f32.partialorder %v913_v6, 0.0  ;;  %v921_v13 = vadd.f32 -0.039733864, %v1460_v29 }
 0x1ec   :  { %833 = vst [vmem:[#allocation5 + $0x50] sm:$0xff] %v801_v10  ;;  %834 = vst [vmem:[#allocation5 + $0x58] sm:$0xff] %v802_v26  ;;  %v682_v17 = vmul.f32 %v1038_v11, %v1533_v46  ;;  %v747_v20 = vsel %vm731_vm3, %v715_v14, %v1498_v44  ;;  %v716_v28 = vsub.f32 %v1501_v27, %v708_v25  ;;  %vm683_vm9 = vcmp.eq.f32.partialorder %v1533_v46, inf  ;;  %v1790_v54 = vld [vmem:[#allocation13_spill] sm:$0xff]  ;;  %v1791_v14 = vld [vmem:[#allocation11_spill] sm:$0xff] }
 0x1ed   :  { %v686_v3 = vand.u32 2147483648, %v1533_v46  ;;  %vm1775_vm10 = vcmp.eq.s32.totalorder %v1166_v47, %v1243_v7  ;;  %v772_v29 = vsel %vm1776_vm11, %v927_v53, %v1289_v23  ;;  %v773_v61 = vsel %vm1777_vm15, %v927_v53, %v1285_v22 }
 0x1ee   :  { %v771_v21 = vsel %vm1775_vm10, %v927_v53, %v1277_v19  ;;  %vm1778_vm12 = vcmp.eq.s32.totalorder %v1183_v51, %v1243_v7  ;;  %v804_v39 = vmul.f32 32.0, %v772_v29  ;;  %v805_v60 = vmul.f32 32.0, %v773_v61 }
 0x1ef   :  { %v774_v44 = vsel %vm1778_vm12, %v927_v53, %v1291_v24  ;;  %v803_v27 = vmul.f32 32.0, %v771_v21  ;;  %v928_v19 = vadd.f32 -0.35, %v747_v20  ;;  %v748_v5 = vsel %vm732_vm8, %v716_v28, %v921_v13  ;;  %v1793_v53 = vld [vmem:[#allocation15_spill] sm:$0xff]  ;;  %v1795_v13 = vld [vmem:[#allocation14_spill] sm:$0xff]  ;;  %v1797_v20 = vld [vmem:[#allocation16_spill] sm:$0xff] }
 0x1f0   :  { %v806_v58 = vmul.f32 32.0, %v774_v44  ;;  %v684_v15 = vsel %vm683_vm9, %v1533_v46, %v682_v17  ;;  %vm685_vm13 = vcmp.eq.f32.partialorder %v1533_v46, 0.0  ;;  %836 = vst [vmem:[#allocation5 + $0x68] sm:$0xff] %v804_v39  ;;  %837 = vst [vmem:[#allocation5 + $0x70] sm:$0xff] %v805_v60  ;;  %v929_v22 = vadd.f32 -0.35, %v748_v5 }
 0x1f1   :  { %835 = vst [vmem:[#allocation5 + $0x60] sm:$0xff] %v803_v27  ;;  %v687_v23 = vsel %vm685_vm13, %v686_v3, %v684_v15  ;;  %v914_v7 = vadd.f32 0.9800666, %v1485_v43  ;;  %vm1779_vm14 = vcmp.eq.s32.totalorder %v1166_v47, %v1307_v30  ;;  %vm1780_vm0 = vcmp.eq.s32.totalorder %v1172_v49, %v1307_v30  ;;  %v1799_v27 = vld [vmem:[#allocation17_spill] sm:$0xff]  ;;  %v1800_v39 = vld [vmem:[#allocation12_spill] sm:$0xff]  ;;  %v1804_v5 = vld [vmem:[#allocation18_spill] sm:$0xff] }
 0x1f2   :  { %838 = vst [vmem:[#allocation5 + $0x78] sm:$0xff] %v806_v58  ;;  %v775_v24 = vsel %vm1779_vm14, %v928_v19, %v1315_v35  ;;  %v776_v0 = vsel %vm1780_vm0, %v928_v19, %v1325_v38  ;;  %vm1781_vm1 = vcmp.eq.s32.totalorder %v1169_v48, %v1307_v30  ;;  %vm1782_vm2 = vcmp.eq.s32.totalorder %v1183_v51, %v1307_v30  ;;  %v1784_v38 = vld [vmem:[#allocation9_spill] sm:$0xff]  ;;  %v1802_v58 = vld [vmem:[#allocation19_spill] sm:$0xff] }
 0x1f3   :  { %v777_v46 = vsel %vm1781_vm1, %v928_v19, %v1323_v37  ;;  %v778_v8 = vsel %vm1782_vm2, %v928_v19, %v1329_v40  ;;  %v807_v63 = vmul.f32 32.0, %v775_v24  ;;  %v808_v50 = vmul.f32 32.0, %v776_v0  ;;  %v1786_v37 = vld [vmem:[#allocation8_spill] sm:$0xff]  ;;  %v1788_v40 = vld [vmem:[#allocation10_spill] sm:$0xff] }
 0x1f4   :  { %v809_v2 = vmul.f32 32.0, %v777_v46  ;;  %v810_v52 = vmul.f32 32.0, %v778_v8  ;;  %vm1783_vm3 = vcmp.eq.s32.totalorder %v1166_v47, %v1309_v33  ;;  %vm1785_vm4 = vcmp.eq.s32.totalorder %v1172_v49, %v1309_v33 }
 0x1f5   :  { %v779_v35 = vsel %vm1783_vm3, %v929_v22, %v1335_v42  ;;  %v780_v34 = vsel %vm1785_vm4, %v929_v22, %v1784_v38  ;;  %vm1787_vm5 = vcmp.eq.s32.totalorder %v1169_v48, %v1309_v33  ;;  %vm1789_vm6 = vcmp.eq.s32.totalorder %v1183_v51, %v1309_v33  ;;  %v1040_v9 = vpop.eup %1039  ;;  %839 = vst [vmem:[#allocation5 + $0x80] sm:$0xff] %v807_v63 }
 0x1f6   :  { %v781_v30 = vsel %vm1787_vm5, %v929_v22, %v1786_v37  ;;  %v782_v4 = vsel %vm1789_vm6, %v929_v22, %v1788_v40  ;;  %840 = vst [vmem:[#allocation5 + $0x88] sm:$0xff] %v808_v50  ;;  %841 = vst [vmem:[#allocation5 + $0x90] sm:$0xff] %v809_v2  ;;  %v811_v42 = vmul.f32 32.0, %v779_v35  ;;  %v812_v36 = vmul.f32 32.0, %v780_v34  ;;  %v1806_v22 = vld [vmem:[#allocation20_spill] sm:$0xff] }
 0x1f7   :  { %842 = vst [vmem:[#allocation5 + $0x98] sm:$0xff] %v810_v52  ;;  %v813_v56 = vmul.f32 32.0, %v781_v30  ;;  %v814_v55 = vmul.f32 32.0, %v782_v4  ;;  %v701_v59 = vmul.f32 0.9800666, %v1485_v43  ;;  %v689_v45 = vmul.f32 %v1040_v9, %v1582_v31 }
 0x1f8   :  { %v709_v12 = vmul.f32 0.19866933, %v687_v23  ;;  %843 = vst [vmem:[#allocation5 + $0xa0] sm:$0xff] %v811_v42  ;;  %844 = vst [vmem:[#allocation5 + $0xa8] sm:$0xff] %v812_v36  ;;  %v922_v33 = vadd.f32 -0.039733864, %v1485_v43  ;;  %vm1792_vm11 = vcmp.eq.s32.totalorder %v1166_v47, %v1791_v14  ;;  %vm1794_vm15 = vcmp.eq.s32.totalorder %v1172_v49, %v1791_v14 }
 0x1f9   :  { %845 = vst [vmem:[#allocation5 + $0xb0] sm:$0xff] %v813_v56  ;;  %846 = vst [vmem:[#allocation5 + $0xb8] sm:$0xff] %v814_v55  ;;  %vm690_vm7 = vcmp.eq.f32.partialorder %v1582_v31, inf  ;;  %v693_v6 = vand.u32 2147483648, %v1582_v31  ;;  %vm692_vm8 = vcmp.eq.f32.partialorder %v1582_v31, 0.0  ;;  %vm733_vm9 = vcmp.gt.f32.partialorder %v914_v7, 0.0 }
 0x1fa   :  { %v717_v57 = vsub.f32 %v701_v59, %v709_v12  ;;  %v691_v16 = vsel %vm690_vm7, %v1582_v31, %v689_v45  ;;  %v915_v18 = vadd.f32 0.9800666, %v1525_v62  ;;  %v702_v1 = vmul.f32 0.9800666, %v1525_v62 }
 0x1fb   :  { %v694_v32 = vsel %vm692_vm8, %v693_v6, %v691_v16  ;;  %v923_v43 = vadd.f32 -0.039733864, %v1525_v62  ;;  %vm1796_vm12 = vcmp.eq.s32.totalorder %v1169_v48, %v1791_v14  ;;  %vm1798_vm13 = vcmp.eq.s32.totalorder %v1183_v51, %v1791_v14 }
 0x1fc   :  { %v749_v41 = vsel %vm733_vm9, %v717_v57, %v922_v33  ;;  %v710_v10 = vmul.f32 0.19866933, %v694_v32  ;;  %vm734_vm10 = vcmp.gt.f32.partialorder %v915_v18, 0.0  ;;  %vm1801_vm14 = vcmp.eq.s32.totalorder %v1166_v47, %v1800_v39 }
 0x1fd   :  { %v930_v26 = vadd.f32 -0.35, %v749_v41  ;;  %vm1803_vm0 = vcmp.eq.s32.totalorder %v1172_v49, %v1800_v39  ;;  %vm1805_vm1 = vcmp.eq.s32.totalorder %v1169_v48, %v1800_v39  ;;  %vm1807_vm2 = vcmp.eq.s32.totalorder %v1183_v51, %v1800_v39 }
 0x1fe   :  { %v718_v11 = vsub.f32 %v702_v1, %v710_v10 }
 0x1ff   :  { %v783_v25 = vsel %vm1792_vm11, %v930_v26, %v1790_v54  ;;  %v784_v31 = vsel %vm1794_vm15, %v930_v26, %v1793_v53  ;;  %v785_v17 = vsel %vm1796_vm12, %v930_v26, %v1795_v13  ;;  %v786_v62 = vsel %vm1798_vm13, %v930_v26, %v1797_v20 }
 0x200   :  { %v815_v28 = vmul.f32 32.0, %v783_v25  ;;  %v816_v3 = vmul.f32 32.0, %v784_v31  ;;  %v817_v21 = vmul.f32 32.0, %v785_v17  ;;  %v818_v29 = vmul.f32 32.0, %v786_v62 }
 0x201   :  { %v750_v61 = vsel %vm734_vm10, %v718_v11, %v923_v43 }
 0x202   :  { %847 = vst [vmem:[#allocation5 + $0xc0] sm:$0xff] %v815_v28  ;;  %848 = vst [vmem:[#allocation5 + $0xc8] sm:$0xff] %v816_v3  ;;  %v931_v44 = vadd.f32 -0.35, %v750_v61 }
 0x203   :  { %849 = vst [vmem:[#allocation5 + $0xd0] sm:$0xff] %v817_v21  ;;  %850 = vst [vmem:[#allocation5 + $0xd8] sm:$0xff] %v818_v29 }
 0x204   :  { %v787_v60 = vsel %vm1801_vm14, %v931_v44, %v1799_v27  ;;  %v788_v19 = vsel %vm1803_vm0, %v931_v44, %v1802_v58  ;;  %v789_v15 = vsel %vm1805_vm1, %v931_v44, %v1804_v5  ;;  %v790_v23 = vsel %vm1807_vm2, %v931_v44, %v1806_v22 }
 0x205   :  { %v819_v7 = vmul.f32 32.0, %v787_v60  ;;  %v820_v24 = vmul.f32 32.0, %v788_v19  ;;  %v821_v0 = vmul.f32 32.0, %v789_v15  ;;  %v822_v47 = vmul.f32 32.0, %v790_v23 }
 0x207   :  { %851 = vst [vmem:[#allocation5 + $0xe0] sm:$0xff] %v819_v7  ;;  %852 = vst [vmem:[#allocation5 + $0xe8] sm:$0xff] %v820_v24 }
 0x208   :  { %853 = vst [vmem:[#allocation5 + $0xf0] sm:$0xff] %v821_v0  ;;  %854 = vst [vmem:[#allocation5 + $0xf8] sm:$0xff] %v822_v47 }
 0x209   :  { %1074 = shalt.err (!%p1071_p12)
}
 0x20a   :  { %s1075_s25 = scalar_lea.hbm %s1722_s3, 4096 }
 0x20b   :  { %p1076_p13 = scmp.ne.s32.totalorder %s1722_s3, %s1075_s25  ;;  %p1079_p0 = scmp.lt.u32.totalorder %s1075_s25, %s1722_s3 }
 0x20d   :  { %p1081_p1 = pnand %p1079_p0, %p1076_p13 }
 0x20f   :  { %1084 = shalt.err (!%p1081_p1)
}
 0x210   :  { %s1094_s29 = smov 512   ;;  %s1095_s30 = smov 32  }
 0x211   :  { %866 = dma.vmem_to_hbm [thread:$0]  %s861_s21, 4096, %s1722_s3, [#allocation4], %s1094_s29, %s1094_s29, %s1095_s30  }
 0x212   :  { %1087 = dma.done.wait [#allocation4], 4096  }
 0x213   :  { %1088 = vsyncadd [#allocation4], 4294963200 }
 0x214   :  { %870 = vsyncpa [#allocation3], 1 }
 0x215   :  { %871 = vsyncpa [#allocation4], 1 }

</bundles_post_ra>
